<compile_context>
chip_gen: v6e
topology: v6e:2x2x1
jax: 0.10.0
libtpu: 0.0.40
codegen_flags: <defaults>
</compile_context>

<pallas_src>
import jax
import jax.numpy as jnp
from jax import lax
from jax.experimental import pallas as pl
from jax.experimental.pallas import tpu as pltpu


# ----------------------------- in-kernel helpers -----------------------------

def _leaky_relu(x, alpha=0.2):
    return jnp.where(x >= 0, x, alpha * x)


def _elu(x):
    return jnp.where(x > 0, x, jnp.exp(x) - 1.0)


def _sigmoid(x):
    # exp on the EUP, approximate reciprocal on the EUP -> divide off the VALU.
    return pl.reciprocal(1.0 + jnp.exp(-x), approx=True)


# ------------------------------- fused kernel --------------------------------

def _make_fused_kernel(block_b, N, D):
    bf16 = jnp.bfloat16
    f32 = jnp.float32

    def gat_layer(inp, adj, WH, bpk, wsrc, wdrow):
        # inp  : (R, D) f32 flattened block (R = block_b * N)
        # adj  : (R, N) f32
        # WH   : (D, 2D) bf16 = [W | Hw^T]      bpk: (1, 2D) f32 = [b | Hb]
        # wsrc : (D, 1)  bf16                   wdrow: (1, D) bf16
        inp_bf = inp.astype(bf16)
        hg = jnp.dot(inp_bf, WH, preferred_element_type=f32)          # (R, 2D)
        h = hg[:, :D]                                                 # (R, D)
        gate = _sigmoid(hg[:, D:] + bpk[:, D:])                       # (R, D)
        th = jnp.tanh(h).astype(bf16)

        # src scores land in column layout, dst scores directly in row (lane)
        # layout via a transposed-RHS matmul -> no (N,1) transpose needed.
        a_src = jnp.dot(th, wsrc, preferred_element_type=f32)         # (R, 1)
        a_dst = lax.dot_general(wdrow, th, (((1,), (1,)), ((), ())),
                                preferred_element_type=f32)           # (1, R)

        h_bf = h.astype(bf16)
        feat_rows, attn_rows = [], []
        for b in range(block_b):                                      # unrolled, static slices
            lo, hi = b * N, (b + 1) * N
            logits = a_src[lo:hi] + a_dst[:, lo:hi]                   # (N, N)
            logits = _leaky_relu(logits, 0.2)
            # masked_fill_(mask.bool(), -999) with mask = 1 - adj
            logits = jnp.where(adj[lo:hi] == 0.0, jnp.float32(-999.0), logits)
            m = jnp.max(logits, axis=-1, keepdims=True)
            e = jnp.exp(logits - m)
            inv = pl.reciprocal(jnp.sum(e, axis=-1, keepdims=True), approx=True)
            attn = e * inv
            agg = jnp.dot(attn.astype(bf16), h_bf[lo:hi],
                          preferred_element_type=f32)                 # (N, D)
            feat_rows.append(agg)
            attn_rows.append(attn)

        feat = feat_rows[0] if block_b == 1 else jnp.concatenate(feat_rows, axis=0)
        attn_all = attn_rows[0] if block_b == 1 else jnp.concatenate(attn_rows, axis=0)
        feat = _elu(feat + bpk[:, :D])
        out = gate * feat + (1.0 - gate) * inp      # dropout omitted (eval mode)
        return out, attn_all

    def kernel(x_ref, adj_ref, eps_ref,
               WHf_ref, bpf_ref, wsf_ref, wdf_ref,
               WHg_ref, bpg_ref, wsg_ref, wdg_ref,
               WUV_ref, buv_ref,
               feats_ref, A_ref):
        x = x_ref[...]                                                # (R, D)
        adj = adj_ref[...]                                            # (R, N)

        # F(x2): x1 = 0  =>  y1 = x1 + fx2 = fx2
        fx2, f_attn = gat_layer(x, adj, WHf_ref[...], bpf_ref[...],
                                wsf_ref[...], wdf_ref[...])
        # G(y1)
        gy1, g_attn = gat_layer(fx2, adj, WHg_ref[...], bpg_ref[...],
                                wsg_ref[...], wdg_ref[...])

        y2 = x + gy1
        uv = jnp.dot(y2.astype(bf16), WUV_ref[...],
                     preferred_element_type=f32) + buv_ref[...]       # (R, 2D)
        y2_u = uv[:, :D]
        y2_v = uv[:, D:]
        std = jnp.exp(0.5 * y2_v)
        y2_sample = eps_ref[...] * std + y2_u                         # sampling(mu, log_var)
        x2_hat = y2_sample - gy1

        # coalesced, wider stores: one 3D-wide feature slab + one A slab.
        feats_ref[...] = jnp.concatenate([x2_hat, y2_u, y2_v], axis=1)  # (R, 3D)
        A_ref[...] = -(g_attn * f_attn)                                 # (R, N)

    return kernel


# ----------------------------- block-size choice ------------------------------

def _pick_block_b(B, N, D, target_rows=128, vmem_budget_bytes=24 << 20):
    """Pack batches per grid step; keep >=2 steps for v7x megacore; respect VMEM."""
    bb = max(1, target_rows // max(N, 1))          # aim for >=128 rows per matmul
    if B >= 2:
        bb = min(bb, max(1, B // 2))               # >=2 parallel grid steps (v7x: 2 TCs)
    bb = max(1, min(bb, B))
    while B % bb:
        bb -= 1

    def footprint(bb_):                            # crude: 2x (double-buffer) in/out blocks + weights
        R = bb_ * N
        per_step = R * (D + N + D) * 4 + R * (3 * D + N) * 4
        return 2 * per_step + 16 * D * D * 4

    while bb > 1 and footprint(bb) > vmem_budget_bytes:   # v7x: only 64 MiB VMEM
        bb -= 1
        while B % bb:
            bb -= 1
    return bb


# ------------------------------ parameter init --------------------------------

def init_gat_params(key, D):
    ks = jax.random.split(key, 6)
    W = 0.1 * jax.random.normal(ks[0], (D, D), jnp.float32)
    b = 0.1 * jax.random.normal(ks[1], (1, D), jnp.float32)
    wsrc = 0.1 * jax.random.normal(ks[2], (D, 1), jnp.float32)
    wdst = 0.1 * jax.random.normal(ks[3], (D, 1), jnp.float32)
    Hw = 0.1 * jax.random.normal(ks[4], (D, D), jnp.float32)     # nn.Linear weight (out,in)
    Hb = 0.1 * jax.random.normal(ks[5], (1, D), jnp.float32)
    return (W, b, wsrc, wdst, Hw.T, Hb)                          # H weight pre-transposed


def init_linear_params(key, D):
    kw, kb = jax.random.split(key)
    Wt = 0.1 * jax.random.normal(kw, (D, D), jnp.float32)        # nn.Linear weight (out,in)
    bb = 0.1 * jax.random.normal(kb, (1, D), jnp.float32)
    return Wt.T, bb                                              # y = x @ W.T + b


def _pack_gat_params(params):
    W, b, wsrc, wdst, HwT, Hb = params
    WH = jnp.concatenate([W, HwT], axis=1).astype(jnp.bfloat16)          # (D, 2D)
    bpk = jnp.concatenate([b, Hb], axis=1).astype(jnp.float32)           # (1, 2D)
    return WH, bpk, wsrc.astype(jnp.bfloat16), wdst.T.astype(jnp.bfloat16)


# -------------------------------- full forward --------------------------------

@jax.jit
def flow_gat_forward(doc_sents_h, adj, eps, f_params, g_params, y2u_params, y2v_params):
    B, N, D = doc_sents_h.shape

    block_b = _pick_block_b(B, N, D)
    if (block_b * N) % 8 != 0:          # (8,128) rule: fall back to full-array block
        block_b = B
    R = block_b * N
    grid = (B // block_b,)

    x_flat = doc_sents_h.reshape(B * N, D).astype(jnp.float32)
    adj_flat = adj.reshape(B * N, N).astype(jnp.float32)
    eps_flat = eps.reshape(B * N, D).astype(jnp.float32)

    WHf, bpf, wsf, wdf = _pack_gat_params(f_params)
    WHg, bpg, wsg, wdg = _pack_gat_params(g_params)
    WUV = jnp.concatenate([y2u_params[0], y2v_params[0]], axis=1).astype(jnp.bfloat16)  # (D, 2D)
    buv = jnp.concatenate([y2u_params[1], y2v_params[1]], axis=1).astype(jnp.float32)   # (1, 2D)

    def row_spec(cols):
        return pl.BlockSpec((R, cols), lambda i: (i, 0))

    def w_spec(shape):
        # grid-invariant index_map -> Pallas fetches the weight block exactly once.
        return pl.BlockSpec(shape, lambda i: (0, 0))

    kernel = _make_fused_kernel(block_b, N, D)

    feats, A_flat = pl.pallas_call(
        kernel,
        out_shape=(jax.ShapeDtypeStruct((B * N, 3 * D), jnp.float32),
                   jax.ShapeDtypeStruct((B * N, N), jnp.float32)),
        grid=grid,
        in_specs=[
            row_spec(D),            # x (flattened)
            row_spec(N),            # adj (flattened)
            row_spec(D),            # eps (flattened)
            w_spec((D, 2 * D)), w_spec((1, 2 * D)), w_spec((D, 1)), w_spec((1, D)),   # F
            w_spec((D, 2 * D)), w_spec((1, 2 * D)), w_spec((D, 1)), w_spec((1, D)),   # G
            w_spec((D, 2 * D)), w_spec((1, 2 * D)),                                   # y2u|y2v
        ],
        out_specs=(row_spec(3 * D), row_spec(N)),
        compiler_params=pltpu.CompilerParams(dimension_semantics=("parallel",)),
    )(x_flat, adj_flat, eps_flat,
      WHf, bpf, wsf, wdf, WHg, bpg, wsg, wdg, WUV, buv)

    feats = feats.reshape(B, N, 3 * D)
    x2_hat = feats[..., :D]
    y2_u = feats[..., D:2 * D]
    y2_v = feats[..., 2 * D:]
    A = A_flat.reshape(B, N, N)
    x1_hat = jnp.zeros_like(x2_hat)     # y1 - fx2 with x1 == 0 is identically zero
    return x1_hat, x2_hat, A, y2_u, y2_v


# ----------------------------------- main --------------------------------------

if __name__ == "__main__":
    B, N, D = 4, 8, 32                              # batch, seq_len, emb_dim
    key = jax.random.PRNGKey(0)
    k_x, k_eps, k_f, k_g, k_u, k_v = jax.random.split(key, 6)

    doc_sents_h = jax.random.normal(k_x, (B, N, D), jnp.float32)
    doc_len = jnp.array([8, 6, 7, 5], jnp.int32)

    # 0/1 adjacency: fully connected within each document's valid length.
    pos = jnp.arange(N)
    valid = (pos[None, :] < doc_len[:, None]).astype(jnp.float32)       # (B, N)
    adj = valid[:, :, None] * valid[:, None, :]                          # (B, N, N)

    # eps for the reparameterization trick (torch.randn_like(std) equivalent).
    eps = jax.random.normal(k_eps, (B, N, D), jnp.float32)

    f_params = init_gat_params(k_f, D)
    g_params = init_gat_params(k_g, D)
    y2u_params = init_linear_params(k_u, D)
    y2v_params = init_linear_params(k_v, D)
    # NOTE: self.y1u / self.y1v exist in __init__ but are unused in forward().

    outs = flow_gat_forward(doc_sents_h, adj, eps,
                            f_params, g_params, y2u_params, y2v_params)
    outs = jax.block_until_ready(outs)

    x1_hat, x2_hat, A, y2_u, y2_v = outs
    assert x1_hat.shape == (B, N, D)
    assert x2_hat.shape == (B, N, D)
    assert A.shape == (B, N, N)
    assert y2_u.shape == (B, N, D)
    assert y2_v.shape == (B, N, D)
    for t in (x2_hat, A, y2_u, y2_v):
        assert bool(jnp.all(jnp.isfinite(t)))
    assert bool(jnp.all(x1_hat == 0.0))

    print("KERNEL_OK")
</pallas_src>

<mosaic_0001>
module attributes {stable_mosaic.version = 11 : i64} {
  func.func @kernel(%arg0: i32, %arg1: memref<16x32xf32, #tpu.memory_space<vmem>>, %arg2: memref<16x8xf32, #tpu.memory_space<vmem>>, %arg3: memref<16x32xf32, #tpu.memory_space<vmem>>, %arg4: memref<32x64xbf16, #tpu.memory_space<vmem>>, %arg5: memref<1x64xf32, #tpu.memory_space<vmem>>, %arg6: memref<32x1xbf16, #tpu.memory_space<vmem>>, %arg7: memref<1x32xbf16, #tpu.memory_space<vmem>>, %arg8: memref<32x64xbf16, #tpu.memory_space<vmem>>, %arg9: memref<1x64xf32, #tpu.memory_space<vmem>>, %arg10: memref<32x1xbf16, #tpu.memory_space<vmem>>, %arg11: memref<1x32xbf16, #tpu.memory_space<vmem>>, %arg12: memref<32x64xbf16, #tpu.memory_space<vmem>>, %arg13: memref<1x64xf32, #tpu.memory_space<vmem>>, %arg14: memref<16x96xf32, #tpu.memory_space<vmem>>, %arg15: memref<16x8xf32, #tpu.memory_space<vmem>>) attributes {dimension_semantics = [#tpu.dimension_semantics<parallel>], iteration_bounds = array<i64: 2>, scalar_prefetch = 0 : i64, scratch_operands = 0 : i64, tpu.core_type = #tpu.core_type<tc>, window_params = [{transform_indices = @transform_0, window_bounds = array<i64: 16, 32>}, {transform_indices = @transform_1, window_bounds = array<i64: 16, 8>}, {transform_indices = @transform_2, window_bounds = array<i64: 16, 32>}, {pipeline_mode = #tpu.pipeline_mode<synchronous>, transform_indices = @transform_3, window_bounds = array<i64: 32, 64>}, {pipeline_mode = #tpu.pipeline_mode<synchronous>, transform_indices = @transform_4, window_bounds = array<i64: 1, 64>}, {pipeline_mode = #tpu.pipeline_mode<synchronous>, transform_indices = @transform_5, window_bounds = array<i64: 32, 1>}, {pipeline_mode = #tpu.pipeline_mode<synchronous>, transform_indices = @transform_6, window_bounds = array<i64: 1, 32>}, {pipeline_mode = #tpu.pipeline_mode<synchronous>, transform_indices = @transform_7, window_bounds = array<i64: 32, 64>}, {pipeline_mode = #tpu.pipeline_mode<synchronous>, transform_indices = @transform_8, window_bounds = array<i64: 1, 64>}, {pipeline_mode = #tpu.pipeline_mode<synchronous>, transform_indices = @transform_9, window_bounds = array<i64: 32, 1>}, {pipeline_mode = #tpu.pipeline_mode<synchronous>, transform_indices = @transform_10, window_bounds = array<i64: 1, 32>}, {pipeline_mode = #tpu.pipeline_mode<synchronous>, transform_indices = @transform_11, window_bounds = array<i64: 32, 64>}, {pipeline_mode = #tpu.pipeline_mode<synchronous>, transform_indices = @transform_12, window_bounds = array<i64: 1, 64>}, {transform_indices = @transform_13, window_bounds = array<i64: 16, 96>}, {transform_indices = @transform_14, window_bounds = array<i64: 16, 8>}]} {
    %c0 = arith.constant 0 : index
    %c0_0 = arith.constant 0 : index
    %0 = vector.load %arg1[%c0, %c0_0] : memref<16x32xf32, #tpu.memory_space<vmem>>, vector<16x32xf32>
    %c0_1 = arith.constant 0 : index
    %c0_2 = arith.constant 0 : index
    %1 = vector.load %arg2[%c0_1, %c0_2] : memref<16x8xf32, #tpu.memory_space<vmem>>, vector<16x8xf32>
    %c0_3 = arith.constant 0 : index
    %c0_4 = arith.constant 0 : index
    %2 = vector.load %arg4[%c0_3, %c0_4] : memref<32x64xbf16, #tpu.memory_space<vmem>>, vector<32x64xbf16>
    %c0_5 = arith.constant 0 : index
    %c0_6 = arith.constant 0 : index
    %3 = vector.load %arg5[%c0_5, %c0_6] : memref<1x64xf32, #tpu.memory_space<vmem>>, vector<1x64xf32>
    %c0_7 = arith.constant 0 : index
    %c0_8 = arith.constant 0 : index
    %4 = vector.load %arg6[%c0_7, %c0_8] : memref<32x1xbf16, #tpu.memory_space<vmem>>, vector<32x1xbf16>
    %c0_9 = arith.constant 0 : index
    %c0_10 = arith.constant 0 : index
    %5 = vector.load %arg7[%c0_9, %c0_10] : memref<1x32xbf16, #tpu.memory_space<vmem>>, vector<1x32xbf16>
    %6 = arith.truncf %0 : vector<16x32xf32> to vector<16x32xbf16>
    %cst = arith.constant dense<0.000000e+00> : vector<16x64xf32>
    %7 = tpu.matmul %6, %2, %cst {dimension_numbers = #tpu.dot_dimension_numbers<[1], [0], [0], [1], [0, 0, 1, 1], [], []>} : vector<16x32xbf16>, vector<32x64xbf16>, vector<16x64xf32> -> vector<16x64xf32>
    %8 = vector.extract_strided_slice %7 {offsets = [0, 0], sizes = [16, 32], strides = [1, 1]} : vector<16x64xf32> to vector<16x32xf32>
    %9 = vector.extract_strided_slice %7 {offsets = [0, 32], sizes = [16, 32], strides = [1, 1]} : vector<16x64xf32> to vector<16x32xf32>
    %10 = vector.extract_strided_slice %3 {offsets = [0, 32], sizes = [1, 32], strides = [1, 1]} : vector<1x64xf32> to vector<1x32xf32>
    %11 = vector.broadcast %10 : vector<1x32xf32> to vector<16x32xf32>
    %12 = arith.addf %9, %11 : vector<16x32xf32>
    %cst_11 = arith.constant 0.000000e+00 : f32
    %13 = vector.broadcast %cst_11 : f32 to vector<16x32xf32>
    %14 = arith.subf %13, %12 : vector<16x32xf32>
    %15 = math.exp %14 : vector<16x32xf32>
    %cst_12 = arith.constant 1.000000e+00 : f32
    %16 = vector.broadcast %cst_12 : f32 to vector<16x32xf32>
    %17 = arith.addf %16, %15 : vector<16x32xf32>
    %18 = tpu.reciprocal %17 {approx = true} : vector<16x32xf32> -> vector<16x32xf32>
    %19 = math.tanh %8 : vector<16x32xf32>
    %20 = arith.truncf %19 : vector<16x32xf32> to vector<16x32xbf16>
    %cst_13 = arith.constant dense<0.000000e+00> : vector<16x1xf32>
    %21 = tpu.matmul %20, %4, %cst_13 {dimension_numbers = #tpu.dot_dimension_numbers<[1], [0], [0], [1], [0, 0, 1, 1], [], []>} : vector<16x32xbf16>, vector<32x1xbf16>, vector<16x1xf32> -> vector<16x1xf32>
    %cst_14 = arith.constant dense<0.000000e+00> : vector<1x16xf32>
    %22 = tpu.matmul %5, %20, %cst_14 {dimension_numbers = #tpu.dot_dimension_numbers<[1], [1], [0], [0], [0, 0, 1, 0], [], []>} : vector<1x32xbf16>, vector<16x32xbf16>, vector<1x16xf32> -> vector<1x16xf32>
    %23 = arith.truncf %8 : vector<16x32xf32> to vector<16x32xbf16>
    %24 = vector.extract_strided_slice %21 {offsets = [0, 0], sizes = [8, 1], strides = [1, 1]} : vector<16x1xf32> to vector<8x1xf32>
    %25 = vector.extract_strided_slice %22 {offsets = [0, 0], sizes = [1, 8], strides = [1, 1]} : vector<1x16xf32> to vector<1x8xf32>
    %26 = vector.broadcast %24 : vector<8x1xf32> to vector<8x8xf32>
    %27 = vector.broadcast %25 : vector<1x8xf32> to vector<8x8xf32>
    %28 = arith.addf %26, %27 : vector<8x8xf32>
    %cst_15 = arith.constant 0.000000e+00 : f32
    %29 = vector.broadcast %cst_15 : f32 to vector<8x8xf32>
    %30 = arith.cmpf oge, %28, %29 : vector<8x8xf32>
    %cst_16 = arith.constant 2.000000e-01 : f32
    %31 = vector.broadcast %cst_16 : f32 to vector<8x8xf32>
    %32 = arith.mulf %31, %28 : vector<8x8xf32>
    %33 = arith.select %30, %28, %32 : vector<8x8xi1>, vector<8x8xf32>
    %34 = vector.extract_strided_slice %1 {offsets = [0, 0], sizes = [8, 8], strides = [1, 1]} : vector<16x8xf32> to vector<8x8xf32>
    %cst_17 = arith.constant 0.000000e+00 : f32
    %35 = vector.broadcast %cst_17 : f32 to vector<8x8xf32>
    %36 = arith.cmpf oeq, %34, %35 : vector<8x8xf32>
    %cst_18 = arith.constant -9.990000e+02 : f32
    %37 = vector.broadcast %cst_18 : f32 to vector<8x8xf32>
    %38 = arith.select %36, %37, %33 : vector<8x8xi1>, vector<8x8xf32>
    %cst_19 = arith.constant dense<0xFF800000> : vector<8xf32>
    %39 = vector.multi_reduction <maximumf>, %38, %cst_19 [1] : vector<8x8xf32> to vector<8xf32>
    %40 = vector.shape_cast %39 : vector<8xf32> to vector<8x1xf32>
    %41 = vector.broadcast %40 : vector<8x1xf32> to vector<8x8xf32>
    %42 = arith.subf %38, %41 : vector<8x8xf32>
    %43 = math.exp %42 : vector<8x8xf32>
    %cst_20 = arith.constant dense<0.000000e+00> : vector<8xf32>
    %44 = vector.multi_reduction <add>, %43, %cst_20 [1] : vector<8x8xf32> to vector<8xf32>
    %45 = vector.shape_cast %44 : vector<8xf32> to vector<8x1xf32>
    %46 = tpu.reciprocal %45 {approx = true} : vector<8x1xf32> -> vector<8x1xf32>
    %47 = vector.broadcast %46 : vector<8x1xf32> to vector<8x8xf32>
    %48 = arith.mulf %43, %47 : vector<8x8xf32>
    %49 = arith.truncf %48 : vector<8x8xf32> to vector<8x8xbf16>
    %50 = vector.extract_strided_slice %23 {offsets = [0, 0], sizes = [8, 32], strides = [1, 1]} : vector<16x32xbf16> to vector<8x32xbf16>
    %cst_21 = arith.constant dense<0.000000e+00> : vector<8x32xf32>
    %51 = tpu.matmul %49, %50, %cst_21 {dimension_numbers = #tpu.dot_dimension_numbers<[1], [0], [0], [1], [0, 0, 1, 1], [], []>} : vector<8x8xbf16>, vector<8x32xbf16>, vector<8x32xf32> -> vector<8x32xf32>
    %52 = vector.extract_strided_slice %21 {offsets = [8, 0], sizes = [8, 1], strides = [1, 1]} : vector<16x1xf32> to vector<8x1xf32>
    %53 = vector.extract_strided_slice %22 {offsets = [0, 8], sizes = [1, 8], strides = [1, 1]} : vector<1x16xf32> to vector<1x8xf32>
    %54 = vector.broadcast %52 : vector<8x1xf32> to vector<8x8xf32>
    %55 = vector.broadcast %53 : vector<1x8xf32> to vector<8x8xf32>
    %56 = arith.addf %54, %55 : vector<8x8xf32>
    %cst_22 = arith.constant 0.000000e+00 : f32
    %57 = vector.broadcast %cst_22 : f32 to vector<8x8xf32>
    %58 = arith.cmpf oge, %56, %57 : vector<8x8xf32>
    %cst_23 = arith.constant 2.000000e-01 : f32
    %59 = vector.broadcast %cst_23 : f32 to vector<8x8xf32>
    %60 = arith.mulf %59, %56 : vector<8x8xf32>
    %61 = arith.select %58, %56, %60 : vector<8x8xi1>, vector<8x8xf32>
    %62 = vector.extract_strided_slice %1 {offsets = [8, 0], sizes = [8, 8], strides = [1, 1]} : vector<16x8xf32> to vector<8x8xf32>
    %cst_24 = arith.constant 0.000000e+00 : f32
    %63 = vector.broadcast %cst_24 : f32 to vector<8x8xf32>
    %64 = arith.cmpf oeq, %62, %63 : vector<8x8xf32>
    %cst_25 = arith.constant -9.990000e+02 : f32
    %65 = vector.broadcast %cst_25 : f32 to vector<8x8xf32>
    %66 = arith.select %64, %65, %61 : vector<8x8xi1>, vector<8x8xf32>
    %cst_26 = arith.constant dense<0xFF800000> : vector<8xf32>
    %67 = vector.multi_reduction <maximumf>, %66, %cst_26 [1] : vector<8x8xf32> to vector<8xf32>
    %68 = vector.shape_cast %67 : vector<8xf32> to vector<8x1xf32>
    %69 = vector.broadcast %68 : vector<8x1xf32> to vector<8x8xf32>
    %70 = arith.subf %66, %69 : vector<8x8xf32>
    %71 = math.exp %70 : vector<8x8xf32>
    %cst_27 = arith.constant dense<0.000000e+00> : vector<8xf32>
    %72 = vector.multi_reduction <add>, %71, %cst_27 [1] : vector<8x8xf32> to vector<8xf32>
    %73 = vector.shape_cast %72 : vector<8xf32> to vector<8x1xf32>
    %74 = tpu.reciprocal %73 {approx = true} : vector<8x1xf32> -> vector<8x1xf32>
    %75 = vector.broadcast %74 : vector<8x1xf32> to vector<8x8xf32>
    %76 = arith.mulf %71, %75 : vector<8x8xf32>
    %77 = arith.truncf %76 : vector<8x8xf32> to vector<8x8xbf16>
    %78 = vector.extract_strided_slice %23 {offsets = [8, 0], sizes = [8, 32], strides = [1, 1]} : vector<16x32xbf16> to vector<8x32xbf16>
    %cst_28 = arith.constant dense<0.000000e+00> : vector<8x32xf32>
    %79 = tpu.matmul %77, %78, %cst_28 {dimension_numbers = #tpu.dot_dimension_numbers<[1], [0], [0], [1], [0, 0, 1, 1], [], []>} : vector<8x8xbf16>, vector<8x32xbf16>, vector<8x32xf32> -> vector<8x32xf32>
    %80 = tpu.concatenate %51, %79 in 0 : vector<8x32xf32>, vector<8x32xf32> -> vector<16x32xf32>
    %81 = tpu.concatenate %48, %76 in 0 : vector<8x8xf32>, vector<8x8xf32> -> vector<16x8xf32>
    %82 = vector.extract_strided_slice %3 {offsets = [0, 0], sizes = [1, 32], strides = [1, 1]} : vector<1x64xf32> to vector<1x32xf32>
    %83 = vector.broadcast %82 : vector<1x32xf32> to vector<16x32xf32>
    %84 = arith.addf %80, %83 : vector<16x32xf32>
    %cst_29 = arith.constant 0.000000e+00 : f32
    %85 = vector.broadcast %cst_29 : f32 to vector<16x32xf32>
    %86 = arith.cmpf ogt, %84, %85 : vector<16x32xf32>
    %87 = math.exp %84 : vector<16x32xf32>
    %cst_30 = arith.constant 1.000000e+00 : f32
    %88 = vector.broadcast %cst_30 : f32 to vector<16x32xf32>
    %89 = arith.subf %87, %88 : vector<16x32xf32>
    %90 = arith.select %86, %84, %89 : vector<16x32xi1>, vector<16x32xf32>
    %91 = arith.mulf %18, %90 : vector<16x32xf32>
    %cst_31 = arith.constant 1.000000e+00 : f32
    %92 = vector.broadcast %cst_31 : f32 to vector<16x32xf32>
    %93 = arith.subf %92, %18 : vector<16x32xf32>
    %94 = arith.mulf %93, %0 : vector<16x32xf32>
    %95 = arith.addf %91, %94 : vector<16x32xf32>
    %c0_32 = arith.constant 0 : index
    %c0_33 = arith.constant 0 : index
    %96 = vector.load %arg8[%c0_32, %c0_33] : memref<32x64xbf16, #tpu.memory_space<vmem>>, vector<32x64xbf16>
    %c0_34 = arith.constant 0 : index
    %c0_35 = arith.constant 0 : index
    %97 = vector.load %arg9[%c0_34, %c0_35] : memref<1x64xf32, #tpu.memory_space<vmem>>, vector<1x64xf32>
    %c0_36 = arith.constant 0 : index
    %c0_37 = arith.constant 0 : index
    %98 = vector.load %arg10[%c0_36, %c0_37] : memref<32x1xbf16, #tpu.memory_space<vmem>>, vector<32x1xbf16>
    %c0_38 = arith.constant 0 : index
    %c0_39 = arith.constant 0 : index
    %99 = vector.load %arg11[%c0_38, %c0_39] : memref<1x32xbf16, #tpu.memory_space<vmem>>, vector<1x32xbf16>
    %100 = arith.truncf %95 : vector<16x32xf32> to vector<16x32xbf16>
    %cst_40 = arith.constant dense<0.000000e+00> : vector<16x64xf32>
    %101 = tpu.matmul %100, %96, %cst_40 {dimension_numbers = #tpu.dot_dimension_numbers<[1], [0], [0], [1], [0, 0, 1, 1], [], []>} : vector<16x32xbf16>, vector<32x64xbf16>, vector<16x64xf32> -> vector<16x64xf32>
    %102 = vector.extract_strided_slice %101 {offsets = [0, 0], sizes = [16, 32], strides = [1, 1]} : vector<16x64xf32> to vector<16x32xf32>
    %103 = vector.extract_strided_slice %101 {offsets = [0, 32], sizes = [16, 32], strides = [1, 1]} : vector<16x64xf32> to vector<16x32xf32>
    %104 = vector.extract_strided_slice %97 {offsets = [0, 32], sizes = [1, 32], strides = [1, 1]} : vector<1x64xf32> to vector<1x32xf32>
    %105 = vector.broadcast %104 : vector<1x32xf32> to vector<16x32xf32>
    %106 = arith.addf %103, %105 : vector<16x32xf32>
    %cst_41 = arith.constant 0.000000e+00 : f32
    %107 = vector.broadcast %cst_41 : f32 to vector<16x32xf32>
    %108 = arith.subf %107, %106 : vector<16x32xf32>
    %109 = math.exp %108 : vector<16x32xf32>
    %cst_42 = arith.constant 1.000000e+00 : f32
    %110 = vector.broadcast %cst_42 : f32 to vector<16x32xf32>
    %111 = arith.addf %110, %109 : vector<16x32xf32>
    %112 = tpu.reciprocal %111 {approx = true} : vector<16x32xf32> -> vector<16x32xf32>
    %113 = math.tanh %102 : vector<16x32xf32>
    %114 = arith.truncf %113 : vector<16x32xf32> to vector<16x32xbf16>
    %cst_43 = arith.constant dense<0.000000e+00> : vector<16x1xf32>
    %115 = tpu.matmul %114, %98, %cst_43 {dimension_numbers = #tpu.dot_dimension_numbers<[1], [0], [0], [1], [0, 0, 1, 1], [], []>} : vector<16x32xbf16>, vector<32x1xbf16>, vector<16x1xf32> -> vector<16x1xf32>
    %cst_44 = arith.constant dense<0.000000e+00> : vector<1x16xf32>
    %116 = tpu.matmul %99, %114, %cst_44 {dimension_numbers = #tpu.dot_dimension_numbers<[1], [1], [0], [0], [0, 0, 1, 0], [], []>} : vector<1x32xbf16>, vector<16x32xbf16>, vector<1x16xf32> -> vector<1x16xf32>
    %117 = arith.truncf %102 : vector<16x32xf32> to vector<16x32xbf16>
    %118 = vector.extract_strided_slice %115 {offsets = [0, 0], sizes = [8, 1], strides = [1, 1]} : vector<16x1xf32> to vector<8x1xf32>
    %119 = vector.extract_strided_slice %116 {offsets = [0, 0], sizes = [1, 8], strides = [1, 1]} : vector<1x16xf32> to vector<1x8xf32>
    %120 = vector.broadcast %118 : vector<8x1xf32> to vector<8x8xf32>
    %121 = vector.broadcast %119 : vector<1x8xf32> to vector<8x8xf32>
    %122 = arith.addf %120, %121 : vector<8x8xf32>
    %cst_45 = arith.constant 0.000000e+00 : f32
    %123 = vector.broadcast %cst_45 : f32 to vector<8x8xf32>
    %124 = arith.cmpf oge, %122, %123 : vector<8x8xf32>
    %cst_46 = arith.constant 2.000000e-01 : f32
    %125 = vector.broadcast %cst_46 : f32 to vector<8x8xf32>
    %126 = arith.mulf %125, %122 : vector<8x8xf32>
    %127 = arith.select %124, %122, %126 : vector<8x8xi1>, vector<8x8xf32>
    %128 = vector.extract_strided_slice %1 {offsets = [0, 0], sizes = [8, 8], strides = [1, 1]} : vector<16x8xf32> to vector<8x8xf32>
    %cst_47 = arith.constant 0.000000e+00 : f32
    %129 = vector.broadcast %cst_47 : f32 to vector<8x8xf32>
    %130 = arith.cmpf oeq, %128, %129 : vector<8x8xf32>
    %cst_48 = arith.constant -9.990000e+02 : f32
    %131 = vector.broadcast %cst_48 : f32 to vector<8x8xf32>
    %132 = arith.select %130, %131, %127 : vector<8x8xi1>, vector<8x8xf32>
    %cst_49 = arith.constant dense<0xFF800000> : vector<8xf32>
    %133 = vector.multi_reduction <maximumf>, %132, %cst_49 [1] : vector<8x8xf32> to vector<8xf32>
    %134 = vector.shape_cast %133 : vector<8xf32> to vector<8x1xf32>
    %135 = vector.broadcast %134 : vector<8x1xf32> to vector<8x8xf32>
    %136 = arith.subf %132, %135 : vector<8x8xf32>
    %137 = math.exp %136 : vector<8x8xf32>
    %cst_50 = arith.constant dense<0.000000e+00> : vector<8xf32>
    %138 = vector.multi_reduction <add>, %137, %cst_50 [1] : vector<8x8xf32> to vector<8xf32>
    %139 = vector.shape_cast %138 : vector<8xf32> to vector<8x1xf32>
    %140 = tpu.reciprocal %139 {approx = true} : vector<8x1xf32> -> vector<8x1xf32>
    %141 = vector.broadcast %140 : vector<8x1xf32> to vector<8x8xf32>
    %142 = arith.mulf %137, %141 : vector<8x8xf32>
    %143 = arith.truncf %142 : vector<8x8xf32> to vector<8x8xbf16>
    %144 = vector.extract_strided_slice %117 {offsets = [0, 0], sizes = [8, 32], strides = [1, 1]} : vector<16x32xbf16> to vector<8x32xbf16>
    %cst_51 = arith.constant dense<0.000000e+00> : vector<8x32xf32>
    %145 = tpu.matmul %143, %144, %cst_51 {dimension_numbers = #tpu.dot_dimension_numbers<[1], [0], [0], [1], [0, 0, 1, 1], [], []>} : vector<8x8xbf16>, vector<8x32xbf16>, vector<8x32xf32> -> vector<8x32xf32>
    %146 = vector.extract_strided_slice %115 {offsets = [8, 0], sizes = [8, 1], strides = [1, 1]} : vector<16x1xf32> to vector<8x1xf32>
    %147 = vector.extract_strided_slice %116 {offsets = [0, 8], sizes = [1, 8], strides = [1, 1]} : vector<1x16xf32> to vector<1x8xf32>
    %148 = vector.broadcast %146 : vector<8x1xf32> to vector<8x8xf32>
    %149 = vector.broadcast %147 : vector<1x8xf32> to vector<8x8xf32>
    %150 = arith.addf %148, %149 : vector<8x8xf32>
    %cst_52 = arith.constant 0.000000e+00 : f32
    %151 = vector.broadcast %cst_52 : f32 to vector<8x8xf32>
    %152 = arith.cmpf oge, %150, %151 : vector<8x8xf32>
    %cst_53 = arith.constant 2.000000e-01 : f32
    %153 = vector.broadcast %cst_53 : f32 to vector<8x8xf32>
    %154 = arith.mulf %153, %150 : vector<8x8xf32>
    %155 = arith.select %152, %150, %154 : vector<8x8xi1>, vector<8x8xf32>
    %156 = vector.extract_strided_slice %1 {offsets = [8, 0], sizes = [8, 8], strides = [1, 1]} : vector<16x8xf32> to vector<8x8xf32>
    %cst_54 = arith.constant 0.000000e+00 : f32
    %157 = vector.broadcast %cst_54 : f32 to vector<8x8xf32>
    %158 = arith.cmpf oeq, %156, %157 : vector<8x8xf32>
    %cst_55 = arith.constant -9.990000e+02 : f32
    %159 = vector.broadcast %cst_55 : f32 to vector<8x8xf32>
    %160 = arith.select %158, %159, %155 : vector<8x8xi1>, vector<8x8xf32>
    %cst_56 = arith.constant dense<0xFF800000> : vector<8xf32>
    %161 = vector.multi_reduction <maximumf>, %160, %cst_56 [1] : vector<8x8xf32> to vector<8xf32>
    %162 = vector.shape_cast %161 : vector<8xf32> to vector<8x1xf32>
    %163 = vector.broadcast %162 : vector<8x1xf32> to vector<8x8xf32>
    %164 = arith.subf %160, %163 : vector<8x8xf32>
    %165 = math.exp %164 : vector<8x8xf32>
    %cst_57 = arith.constant dense<0.000000e+00> : vector<8xf32>
    %166 = vector.multi_reduction <add>, %165, %cst_57 [1] : vector<8x8xf32> to vector<8xf32>
    %167 = vector.shape_cast %166 : vector<8xf32> to vector<8x1xf32>
    %168 = tpu.reciprocal %167 {approx = true} : vector<8x1xf32> -> vector<8x1xf32>
    %169 = vector.broadcast %168 : vector<8x1xf32> to vector<8x8xf32>
    %170 = arith.mulf %165, %169 : vector<8x8xf32>
    %171 = arith.truncf %170 : vector<8x8xf32> to vector<8x8xbf16>
    %172 = vector.extract_strided_slice %117 {offsets = [8, 0], sizes = [8, 32], strides = [1, 1]} : vector<16x32xbf16> to vector<8x32xbf16>
    %cst_58 = arith.constant dense<0.000000e+00> : vector<8x32xf32>
    %173 = tpu.matmul %171, %172, %cst_58 {dimension_numbers = #tpu.dot_dimension_numbers<[1], [0], [0], [1], [0, 0, 1, 1], [], []>} : vector<8x8xbf16>, vector<8x32xbf16>, vector<8x32xf32> -> vector<8x32xf32>
    %174 = tpu.concatenate %145, %173 in 0 : vector<8x32xf32>, vector<8x32xf32> -> vector<16x32xf32>
    %175 = tpu.concatenate %142, %170 in 0 : vector<8x8xf32>, vector<8x8xf32> -> vector<16x8xf32>
    %176 = vector.extract_strided_slice %97 {offsets = [0, 0], sizes = [1, 32], strides = [1, 1]} : vector<1x64xf32> to vector<1x32xf32>
    %177 = vector.broadcast %176 : vector<1x32xf32> to vector<16x32xf32>
    %178 = arith.addf %174, %177 : vector<16x32xf32>
    %cst_59 = arith.constant 0.000000e+00 : f32
    %179 = vector.broadcast %cst_59 : f32 to vector<16x32xf32>
    %180 = arith.cmpf ogt, %178, %179 : vector<16x32xf32>
    %181 = math.exp %178 : vector<16x32xf32>
    %cst_60 = arith.constant 1.000000e+00 : f32
    %182 = vector.broadcast %cst_60 : f32 to vector<16x32xf32>
    %183 = arith.subf %181, %182 : vector<16x32xf32>
    %184 = arith.select %180, %178, %183 : vector<16x32xi1>, vector<16x32xf32>
    %185 = arith.mulf %112, %184 : vector<16x32xf32>
    %cst_61 = arith.constant 1.000000e+00 : f32
    %186 = vector.broadcast %cst_61 : f32 to vector<16x32xf32>
    %187 = arith.subf %186, %112 : vector<16x32xf32>
    %188 = arith.mulf %187, %95 : vector<16x32xf32>
    %189 = arith.addf %185, %188 : vector<16x32xf32>
    %190 = arith.addf %0, %189 : vector<16x32xf32>
    %191 = arith.truncf %190 : vector<16x32xf32> to vector<16x32xbf16>
    %c0_62 = arith.constant 0 : index
    %c0_63 = arith.constant 0 : index
    %192 = vector.load %arg12[%c0_62, %c0_63] : memref<32x64xbf16, #tpu.memory_space<vmem>>, vector<32x64xbf16>
    %cst_64 = arith.constant dense<0.000000e+00> : vector<16x64xf32>
    %193 = tpu.matmul %191, %192, %cst_64 {dimension_numbers = #tpu.dot_dimension_numbers<[1], [0], [0], [1], [0, 0, 1, 1], [], []>} : vector<16x32xbf16>, vector<32x64xbf16>, vector<16x64xf32> -> vector<16x64xf32>
    %c0_65 = arith.constant 0 : index
    %c0_66 = arith.constant 0 : index
    %194 = vector.load %arg13[%c0_65, %c0_66] : memref<1x64xf32, #tpu.memory_space<vmem>>, vector<1x64xf32>
    %195 = vector.broadcast %194 : vector<1x64xf32> to vector<16x64xf32>
    %196 = arith.addf %193, %195 : vector<16x64xf32>
    %197 = vector.extract_strided_slice %196 {offsets = [0, 0], sizes = [16, 32], strides = [1, 1]} : vector<16x64xf32> to vector<16x32xf32>
    %198 = vector.extract_strided_slice %196 {offsets = [0, 32], sizes = [16, 32], strides = [1, 1]} : vector<16x64xf32> to vector<16x32xf32>
    %cst_67 = arith.constant 5.000000e-01 : f32
    %199 = vector.broadcast %cst_67 : f32 to vector<16x32xf32>
    %200 = arith.mulf %199, %198 : vector<16x32xf32>
    %201 = math.exp %200 : vector<16x32xf32>
    %c0_68 = arith.constant 0 : index
    %c0_69 = arith.constant 0 : index
    %202 = vector.load %arg3[%c0_68, %c0_69] : memref<16x32xf32, #tpu.memory_space<vmem>>, vector<16x32xf32>
    %203 = arith.mulf %202, %201 : vector<16x32xf32>
    %204 = arith.addf %203, %197 : vector<16x32xf32>
    %205 = arith.subf %204, %189 : vector<16x32xf32>
    %206 = tpu.concatenate %205, %197, %198 in 1 : vector<16x32xf32>, vector<16x32xf32>, vector<16x32xf32> -> vector<16x96xf32>
    %c0_70 = arith.constant 0 : index
    %c0_71 = arith.constant 0 : index
    %207 = vector.load %arg14[%c0_70, %c0_71] : memref<16x96xf32, #tpu.memory_space<vmem>>, vector<16x96xf32>
    tpu.vector_store %arg14[%c0_70, %c0_71], %206 {strides = array<i32>} : memref<16x96xf32, #tpu.memory_space<vmem>>, vector<16x96xf32>,
    %208 = arith.mulf %175, %81 : vector<16x8xf32>
    %cst_72 = arith.constant 0.000000e+00 : f32
    %209 = vector.broadcast %cst_72 : f32 to vector<16x8xf32>
    %210 = arith.subf %209, %208 : vector<16x8xf32>
    %c0_73 = arith.constant 0 : index
    %c0_74 = arith.constant 0 : index
    %211 = vector.load %arg15[%c0_73, %c0_74] : memref<16x8xf32, #tpu.memory_space<vmem>>, vector<16x8xf32>
    tpu.vector_store %arg15[%c0_73, %c0_74], %210 {strides = array<i32>} : memref<16x8xf32, #tpu.memory_space<vmem>>, vector<16x8xf32>,
    return
  }
  func.func @transform_0(%arg0: i32) -> (i32, i32) {
    %c0_i32 = arith.constant 0 : i32
    %c0_i32_0 = arith.constant 0 : i32
    return %arg0, %c0_i32 : i32, i32
  }
  func.func @transform_1(%arg0: i32) -> (i32, i32) {
    %c0_i32 = arith.constant 0 : i32
    %c0_i32_0 = arith.constant 0 : i32
    return %arg0, %c0_i32 : i32, i32
  }
  func.func @transform_2(%arg0: i32) -> (i32, i32) {
    %c0_i32 = arith.constant 0 : i32
    %c0_i32_0 = arith.constant 0 : i32
    return %arg0, %c0_i32 : i32, i32
  }
  func.func @transform_3(%arg0: i32) -> (i32, i32) {
    %c0_i32 = arith.constant 0 : i32
    %c0_i32_0 = arith.constant 0 : i32
    %c0_i32_1 = arith.constant 0 : i32
    return %c0_i32, %c0_i32_0 : i32, i32
  }
  func.func @transform_4(%arg0: i32) -> (i32, i32) {
    %c0_i32 = arith.constant 0 : i32
    %c0_i32_0 = arith.constant 0 : i32
    %c0_i32_1 = arith.constant 0 : i32
    return %c0_i32, %c0_i32_0 : i32, i32
  }
  func.func @transform_5(%arg0: i32) -> (i32, i32) {
    %c0_i32 = arith.constant 0 : i32
    %c0_i32_0 = arith.constant 0 : i32
    %c0_i32_1 = arith.constant 0 : i32
    return %c0_i32, %c0_i32_0 : i32, i32
  }
  func.func @transform_6(%arg0: i32) -> (i32, i32) {
    %c0_i32 = arith.constant 0 : i32
    %c0_i32_0 = arith.constant 0 : i32
    %c0_i32_1 = arith.constant 0 : i32
    return %c0_i32, %c0_i32_0 : i32, i32
  }
  func.func @transform_7(%arg0: i32) -> (i32, i32) {
    %c0_i32 = arith.constant 0 : i32
    %c0_i32_0 = arith.constant 0 : i32
    %c0_i32_1 = arith.constant 0 : i32
    return %c0_i32, %c0_i32_0 : i32, i32
  }
  func.func @transform_8(%arg0: i32) -> (i32, i32) {
    %c0_i32 = arith.constant 0 : i32
    %c0_i32_0 = arith.constant 0 : i32
    %c0_i32_1 = arith.constant 0 : i32
    return %c0_i32, %c0_i32_0 : i32, i32
  }
  func.func @transform_9(%arg0: i32) -> (i32, i32) {
    %c0_i32 = arith.constant 0 : i32
    %c0_i32_0 = arith.constant 0 : i32
    %c0_i32_1 = arith.constant 0 : i32
    return %c0_i32, %c0_i32_0 : i32, i32
  }
  func.func @transform_10(%arg0: i32) -> (i32, i32) {
    %c0_i32 = arith.constant 0 : i32
    %c0_i32_0 = arith.constant 0 : i32
    %c0_i32_1 = arith.constant 0 : i32
    return %c0_i32, %c0_i32_0 : i32, i32
  }
  func.func @transform_11(%arg0: i32) -> (i32, i32) {
    %c0_i32 = arith.constant 0 : i32
    %c0_i32_0 = arith.constant 0 : i32
    %c0_i32_1 = arith.constant 0 : i32
    return %c0_i32, %c0_i32_0 : i32, i32
  }
  func.func @transform_12(%arg0: i32) -> (i32, i32) {
    %c0_i32 = arith.constant 0 : i32
    %c0_i32_0 = arith.constant 0 : i32
    %c0_i32_1 = arith.constant 0 : i32
    return %c0_i32, %c0_i32_0 : i32, i32
  }
  func.func @transform_13(%arg0: i32) -> (i32, i32) {
    %c0_i32 = arith.constant 0 : i32
    %c0_i32_0 = arith.constant 0 : i32
    return %arg0, %c0_i32 : i32, i32
  }
  func.func @transform_14(%arg0: i32) -> (i32, i32) {
    %c0_i32 = arith.constant 0 : i32
    %c0_i32_0 = arith.constant 0 : i32
    return %arg0, %c0_i32 : i32, i32
  }
}

</mosaic_0001>

<bundles_post_ra>
// kernel: flow_gat_forward.1
= control target key start
LH: loop header
LB: loop body
LE: loop exit
PB: predicated region body
PF: predicated region fallthrough
CT: control target
= control target key end

     0   :  { %s2264_s0 = inlined_call_operand.vmem [shape: f32[32,32], index: 0, kind: input, shape index: {}]   ;;  %s2265_s1 = inlined_call_operand.vmem [shape: f32[32,8], index: 1, kind: input, shape index: {}]   ;;  %s2266_s2 = inlined_call_operand.vmem [shape: f32[32,32], index: 2, kind: input, shape index: {}]   ;;  %s2267_s3 = inlined_call_operand.vmem [shape: bf16[32,64], index: 3, kind: input, shape index: {}]   ;;  %s2268_s4 = inlined_call_operand.vmem [shape: f32[1,64], index: 4, kind: input, shape index: {}]   ;;  %s2269_s5 = inlined_call_operand.vmem [shape: bf16[32,1], index: 5, kind: input, shape index: {}]   ;;  %s2270_s6 = inlined_call_operand.vmem [shape: bf16[1,32], index: 6, kind: input, shape index: {}]   ;;  %s2271_s7 = inlined_call_operand.vmem [shape: bf16[32,64], index: 7, kind: input, shape index: {}]   ;;  %s2272_s8 = inlined_call_operand.vmem [shape: f32[1,64], index: 8, kind: input, shape index: {}]   ;;  %s2273_s9 = inlined_call_operand.vmem [shape: bf16[32,1], index: 9, kind: input, shape index: {}]   ;;  %s2274_s10 = inlined_call_operand.vmem [shape: bf16[1,32], index: 10, kind: input, shape index: {}]   ;;  %s2275_s11 = inlined_call_operand.vmem [shape: bf16[32,64], index: 11, kind: input, shape index: {}]   ;;  %s2276_s12 = inlined_call_operand.vmem [shape: f32[1,64], index: 12, kind: input, shape index: {}]   ;;  %s2277_s13 = inlined_call_operand.vmem [shape: f32[32,96], index: 13, kind: output, shape index: {0}]   ;;  %s2278_s14 = inlined_call_operand.hbm [shape: f32[32,8], index: 14, kind: output, shape index: {1}]  }
   0x1   :  { %2284 = sst [smem:[#allocation5_spill]] %s2264_s0 }
   0x2   :  { %2285 = sst [smem:[#allocation6_spill]] %s2265_s1 }
   0x3   :  { %2286 = sst [smem:[#allocation7_spill]] %s2267_s3 }
   0x4   :  { %2287 = sst [smem:[#allocation8_spill]] %s2268_s4 }
   0x5   :  { %2288 = sst [smem:[#allocation9_spill]] %s2269_s5 }
   0x6   :  { %2289 = sst [smem:[#allocation10_spill]] %s2270_s6 }
   0x7   :  { %2290 = sst [smem:[#allocation11_spill]] %s2271_s7 }
   0x8   :  { %20 = vsyncpa [#allocation3], 0 }
   0x9   :  { %22 = vsyncpa [#allocation3 + $0x1], 0  ;;  %s1935_s29 = smov 0   ;;  %s1937_s30 = smov 0  }
   0xa   :  { %s1939_s15 = smov 0   ;;  %s1941_s16 = smov 0  }
   0xb LB: > { %s1956_s17 = sadd.s32 4294967295, %s1849_s16   ;;  %s1528_s18 = sadd.s32 4294967294, %s1849_s16   ;;  %s1849_s16 = sphi %s1941_s16, %s2306_s16   ;;  %s1845_s15 = sphi %s1939_s15, %s2305_s15   ;;  %s1841_s30 = sphi %s1937_s30, %s2304_s30   ;;  %s1837_s29 = sphi %s1935_s29, %s2303_s29  }
   0xc   : > { %s1960_s19 = sadd.s32 1, %s1849_s16   ;;  %s349_s20 = sadd.s32 1, %s1845_s15 }
   0xd   : > { %s346_s21 = ssub.s32 %s1849_s16, %s1960_s19  ;;  %p359_p0 = scmp.ne.s32.totalorder %s1845_s15, %s1841_s30 }
   0xe   : > { %p347_p1 = scmp.eq.s32.totalorder %s346_s21, 0  ;;  %p360_p2 = scmp.eq.s32.totalorder %s1956_s17, 1 }
   0xf   : > { %p365_p3 = scmp.ne.s32.totalorder %s1841_s30, %s1837_s29  ;;  %p366_p4 = scmp.eq.s32.totalorder %s1528_s18, 1 }
  0x10   : > { %s1971_s22 = scalar_select %p347_p1, %s1845_s15, %s349_s20  }
  0x11   : > { %p1973_p5 = por %p360_p2, %p359_p0  ;;  %p1977_p6 = por %p366_p4, %p365_p3 }
  0x12   : > { %p1531_p7 = scmp.ge.s32.totalorder %s1849_s16, 1  ;;  %p441_p8 = scmp.lt.s32.totalorder %s1849_s16, 3 }
  0x14   : > { %p442_p9 = pnand %p1531_p7, %p441_p8 }
  0x15   : > { %s2293_s3 = sld [smem:[#allocation7_spill]] (!%p442_p9)  ;;  %s1533_s18 = sshll.u32 (!%p442_p9), %s1956_s17, 1 }
  0x16   : > { %445 = sbr.rel (%p442_p9) target bundleno = 3231 (0xc9f), region = 72  ;;  %p503_p10 = scmp.lt.s32.totalorder (!%p442_p9), %s1533_s18, 3 }
  0x17   : > { %s2294_s0 = sld [smem:[#allocation5_spill]] (!%p442_p9)  ;;  %s1854_s27 = smov (!%p442_p9), 120  }
  0x18   : > { %s2295_s5 = sld [smem:[#allocation9_spill]] (!%p442_p9)  ;;  %s2279_s28 = smov (!%p442_p9), 32  }
  0x19   : > { %s2296_s6 = sld [smem:[#allocation10_spill]] (!%p442_p9) }
  0x1a   : > { %s2297_s1 = sld [smem:[#allocation6_spill]] (!%p442_p9) }
  0x1b   : > { %v1727_v0 = vld [vmem:[%s2293_s3 + $0x8] sm:$0xff]   ;;  %v1851_v1 = vmov 0.0   ;;  %v1728_v2 = vld [vmem:[%s2293_s3] sm:$0xff]   ;;  %vm1852_vm0 = vmmov 0   ;;  %s2308_s18 = smov (!%p503_p10, %s1533_s18), 3  ;;  %vm555_vm1 = vcmask 261120   ;;  %v726_v30 = vlaneseq }
  0x1c   : > { %1602 = vmatprep.subr.bf16.mxu0 %v1851_v1  ;;  %1610 = vmatprep.subr.bf16.mxu1 %v1851_v1  ;;  %s1997_s20 = sshll.u32 %s2308_s18, 3  ;;  %vm752_vm2 = vcmask 1043456   ;;  %v1853_v21 = vmov 0   ;;  %vm736_vm6 = vcmask 64512   ;;  %s2298_s4 = sld [smem:[#allocation8_spill]] }
  0x1d   : > { %1603 = vmatpush3.bf16.msra.mxu0 %v1727_v0  ;;  %1606 = vmatprep.mubr.msk.bf16.mxu0 %vm1852_vm0, %v1851_v1  ;;  %s506_s26 = scalar_lea.vmem %s2294_s0, %s1997_s20  ;;  %v2044_v31 = vshrl.u32 %v726_v30, 7  ;;  %s2299_s7 = sld [smem:[#allocation11_spill]] }
  0x1e   : > { %1604 = vmatprep.subr.bf16.mxu0 %v1851_v1  ;;  %1614 = vmatprep.mubr.msk.bf16.mxu1 %vm1852_vm0, %v1851_v1  ;;  %v2004_v3 = vld [vmem:[%s506_s26] sm:$0xff]  ;;  %v2006_v4 = vld [vmem:[%s506_s26 + $0x8] sm:$0xff]  ;;  %s2282_s18 = smov 96   ;;  %s2302_s3 = sand.u32 1, %s1841_s30  }
  0x1f   : > { %v542_v5 = vpack.c.bf16 %v2006_v4, %v2004_v3  ;;  %v1729_v6 = vld [vmem:[%s2295_s5 + $0x8] sm:$0xff]   ;;  %v1730_v7 = vld [vmem:[%s2295_s5] sm:$0xff]   ;;  %1725 = vset.pattern.permute.xlu0 %v1853_v21  ;;  %1726 = vset.pattern.permute.xlu1 %v1853_v21  ;;  %v728_v32 = vsub.s32 0, %v2044_v31 }
  0x20   : > { %1611 = vmatpush3.bf16.msra.mxu1 %v1729_v6  ;;  %v541_v19 = vld [vmem:[%s2296_s6] sm:$0x1]  ;;  %s512_s21 = scalar_lea.vmem %s2297_s1, %s1997_s20  ;;  %s2301_s1 = smov 96  }
  0x21   : > { %1605 = vmatpush3.bf16.msra.mxu0 %v1728_v2  ;;  %1612 = vmatprep.subr.bf16.mxu1 %v1851_v1  ;;  %v2054_v41 = vld [vmem:[%s512_s21] sm:$0xff]  ;;  %v2060_v45 = vld [vmem:[%s512_s21 + $0x8] sm:$0xff] }
  0x22   : > { %1618 = vmatprep.subr.bf16.mxu0 %v1851_v1  ;;  %vm734_vm5 = vcmp.eq.f32.partialorder %v2054_v41, 0.0  ;;  %vm805_vm7 = vcmp.eq.f32.partialorder %v2060_v45, 0.0  ;;  %v1544_v6 = vld [vmem:[%s2298_s4] ss:$0 sm:$0xff]  ;;  %s2209_s4 = scalar_lea.sflag [#allocation3], %s2302_s3 }
  0x24   : > { %1607 = vmatmul.mubr.msk.bf16.vlgmr.msra.gmra.mxu0 %vm555_vm1, %v542_v5  ;;  %1613 = vmatpush3.bf16.msra.mxu1 %v1730_v7 }
  0x25   : > { %1620 = vmatprep.mubr.msk.bf16.mxu0 %vm1852_vm0, %v1851_v1  ;;  %1624 = vmatprep.subr.bf16.mxu1 %v1851_v1 }
  0xe4   : > { %v2021_v8 = vpop.f32.mrf.mxu0 }
  0xe5   : > { %1737 = vtanh.f32 %v2021_v8 }
  0xe6   : > { %v1608_v9 = vpop.f32.mrf.mxu0 }
  0xe8   : > { %v2024_v10 = vpop.f32.mrf.mxu0 }
  0xe9   : > { %1739 = vtanh.f32 %v2024_v10  ;;  %v720_v13 = vpack.c.bf16 %v2024_v10, %v2021_v8  ;;  %v607_v30 = vadd.f32 %v1544_v6, %v2024_v10 }
  0xea   : > { %v1609_v11 = vpop.f32.mrf.mxu0 }
  0xeb   : > { %v754_v16 = vsel %vm752_vm2, %v720_v13, 0  ;;  %v824_v18 = vrot.slane %v720_v13, 4 }
  0xed   : > { %v829_v20 = vsel %vm752_vm2, %v824_v18, 0 }
  0xf2   : > { %v1738_v12 = vpop.eup %1737 }
  0xf6   : > { %v1740_v14 = vpop.eup %1739 }
  0xf7   : > { %v620_v15 = vpack.c.bf16 %v1740_v14, %v1738_v12 }
  0xf9   : > { %1615 = vmatmul.mubr.msk.bf16.vlgmr.msra.gmra.mxu1 %vm555_vm1, %v620_v15  ;;  %v634_v17 = vsel %vm555_vm1, %v620_v15, 0 }
  0xfa   : > { %1625 = vmatpush3.bf16.msra.mxu1 %v754_v16  ;;  %1619 = vmatpush3.bf16.xpose.msra.mxu0 %v634_v17 }
  0xfb   : > { %1630 = vmatprep.subr.bf16.mxu0 %v1851_v1  ;;  %1626 = vmatprep.mubr.msk.bf16.mxu1 %vm1852_vm0, %v1851_v1 }
  0xfc   : > { %1636 = vmatprep.subr.bf16.mxu1 %v1851_v1 }
 0x101   : > { %1621 = vmatmul.mubr.msk.bf16.vlgmr.msra.gmra.mxu0 %vm555_vm1, %v541_v19 }
 0x102   : > { %1631 = vmatpush3.bf16.msra.mxu0 %v829_v20  ;;  %1632 = vmatprep.mubr.msk.bf16.mxu0 %vm1852_vm0, %v1851_v1 }
 0x103   : > { %1644 = vmatprep.subr.bf16.mxu0 %v1851_v1 }
 0x1b9   : > { %v670_v22 = vpop.f32.mrf.mxu1 }
 0x1bb   : > { %v1616_v23 = vpop.f32.mrf.mxu1 }
 0x1bd   : > { %v673_v24 = vpop.f32.mrf.mxu1 }
 0x1be   : > { %798 = vperm.xlu0 %1725, %v673_v24  }
 0x1bf   : > { %v1617_v25 = vpop.f32.mrf.mxu1 }
 0x1c1   : > { %v714_v26 = vpop.f32.mrf.mxu0 }
 0x1c2   : > { %723 = vperm.xlu0 %1725, %v670_v22   ;;  %v729_v33 = vrot.slane %v714_v26, %v728_v32  ;;  %v1731_v26 = vld [vmem:[%s2299_s7 + $0x8] sm:$0xff]  }
 0x1c3   : > { %v1622_v27 = vpop.f32.mrf.mxu0 }
 0x1c5   : > { %v717_v28 = vpop.f32.mrf.mxu0 }
 0x1c6   : > { %v1732_v28 = vld [vmem:[%s2299_s7] sm:$0xff]  }
 0x1c7   : > { %v1623_v29 = vpop.f32.mrf.mxu0 }
 0x1c8   : > { %v606_v29 = vadd.f32 %v1544_v6, %v2021_v8 }
 0x239   : > { %v799_v34 = vpop.permute.xlu0 %798 }
 0x23a   : > { %v801_v35 = vadd.f32 %v799_v34, %v729_v33  ;;  %v609_v34 = vsub.f32 0.0, %v607_v30 }
 0x23c   : > { %vm802_vm3 = vcmp.ge.f32.partialorder %v801_v35, 0.0  ;;  %v803_v36 = vmul.f32 0.2, %v801_v35 }
 0x23d   : > { %v724_v38 = vpop.permute.xlu0 %723 }
 0x23e   : > { %v804_v37 = vsel %vm802_vm3, %v801_v35, %v803_v36  ;;  %v730_v39 = vadd.f32 %v729_v33, %v724_v38  ;;  %v608_v33 = vsub.f32 0.0, %v606_v29  ;;  %v612_v36 = vmul.f32 1.442695, %v609_v34 }
 0x23f   : > { %807 = vrot.lane.b32.xlu1 %v804_v37, %s1854_s27 }
 0x240   : > { %v732_v40 = vmul.f32 0.2, %v730_v39  ;;  %vm731_vm4 = vcmp.ge.f32.partialorder %v730_v39, 0.0  ;;  %v610_v35 = vmul.f32 1.442695, %v608_v33 }
 0x242   : > { %v733_v42 = vsel %vm731_vm4, %v730_v39, %v732_v40 }
 0x243   : > { %v735_v43 = vsel %vm734_vm5, -999.0, %v733_v42 }
 0x244   : > { %v737_v44 = vsel %vm736_vm6, %v735_v43, -inf }
 0x263   : > { %738 = vmax.xlane.f32.xlu1 %v737_v44 }
 0x2b1   : > { %v808_v46 = vpop.permute.xlu1 %807 }
 0x2b2   : > { %v810_v47 = vsel %vm805_vm7, -999.0, %v808_v46 }
 0x2b3   : > { %v811_v48 = vsel %vm736_vm6, %v810_v47, -inf }
 0x2b4   : > { %812 = vmax.xlane.f32.xlu0 %v811_v48 }
 0x2ec   : > { %v739_v49 = vpop.xlane.xlu1 %738 }
 0x2ed   : > { %v740_v50 = vsub.f32 %v735_v43, %v739_v49 }
 0x2ef   : > { %v741_v51 = vmul.f32 1.442695, %v740_v50 }
 0x2f1   : > { %1741 = vpow2.f32 %v741_v51 }
 0x2fe   : > { %v1742_v52 = vpop.eup %1741 }
 0x2ff   : > { %v743_v53 = vsel %vm736_vm6, %v1742_v52, 0.0 }
 0x300   : > { %744 = vadd.xlane.f32.xlu0 %v743_v53 }
 0x33d   : > { %v813_v54 = vpop.xlane.xlu0 %812 }
 0x33e   : > { %v814_v55 = vsub.f32 %v810_v47, %v813_v54 }
 0x340   : > { %v815_v56 = vmul.f32 1.442695, %v814_v55 }
 0x342   : > { %1743 = vpow2.f32 %v815_v56 }
 0x34f   : > { %v1744_v57 = vpop.eup %1743 }
 0x350   : > { %v817_v58 = vsel %vm736_vm6, %v1744_v57, 0.0 }
 0x351   : > { %818 = vadd.xlane.f32.xlu1 %v817_v58  ;;  %v1734_v58 = vld [vmem:[%s2273_s9] sm:$0xff]  }
 0x389   : > { %v745_v59 = vpop.xlane.xlu0 %744 }
 0x38a   : > { %1745 = vrcp.f32 %v745_v59 }
 0x397   : > { %v1746_v60 = vpop.eup %1745 }
 0x398   : > { %v2068_v61 = vmul.f32 %v1746_v60, %v1742_v52 }
 0x39a   : > { %v748_v62 = vpack.c.bf16 %v2068_v61, %v2068_v61 }
 0x39c   : > { %1627 = vmatmul.mubr.msk.bf16.vlgmr.msra.gmra.mxu1 %vm736_vm6, %v748_v62 }
 0x39d   : > { %1640 = vmatprep.mubr.msk.bf16.mxu1 %vm1852_vm0, %v1851_v1  ;;  %1637 = vmatpush3.bf16.msra.mxu1 %v1731_v26 }
 0x39e   : > { %1638 = vmatprep.subr.bf16.mxu1 %v1851_v1 }
 0x3a1   : > { %1639 = vmatpush3.bf16.msra.mxu1 %v1732_v28 }
 0x3a2   : > { %1652 = vmatprep.subr.bf16.mxu1 %v1851_v1 }
 0x3da   : > { %v819_v63 = vpop.xlane.xlu1 %818 }
 0x3db   : > { %1747 = vrcp.f32 %v819_v63 }
 0x3e8   : > { %v1748_v0 = vpop.eup %1747 }
 0x3e9   : > { %v2075_v2 = vmul.f32 %v1748_v0, %v1744_v57  ;;  %v1733_v57 = vld [vmem:[%s2273_s9 + $0x8] sm:$0xff]  }
 0x3eb   : > { %v822_v5 = vpack.c.bf16 %v2075_v2, %v2075_v2 }
 0x3ed   : > { %1633 = vmatmul.mubr.msk.bf16.vlgmr.msra.gmra.mxu0 %vm736_vm6, %v822_v5 }
 0x3ee   : > { %1648 = vmatprep.mubr.msk.bf16.mxu0 %vm1852_vm0, %v1851_v1  ;;  %1645 = vmatpush3.bf16.msra.mxu0 %v1733_v57 }
 0x3ef   : > { %1646 = vmatprep.subr.bf16.mxu0 %v1851_v1 }
 0x3f2   : > { %1647 = vmatpush3.bf16.msra.mxu0 %v1734_v58  ;;  %v1556_v58 = vld [vmem:[%s2272_s8] ss:$0 sm:$0xff] }
 0x3f3   : > { %1658 = vmatprep.subr.bf16.mxu0 %v1851_v1 }
 0x45c   : > { %v790_v7 = vpop.f32.mrf.mxu1 }
 0x45d   : > { %v871_v9 = vadd.f32 %v1544_v6, %v790_v7 }
 0x45e   : > { %v1628_v11 = vpop.f32.mrf.mxu1 }
 0x45f   : > { %v875_v12 = vmul.f32 1.442695, %v871_v9  ;;  %vm873_vm8 = vcmp.gt.f32.partialorder %v871_v9, 0.0 }
 0x460   : > { %v793_v13 = vpop.f32.mrf.mxu1 }
 0x461   : > { %1749 = vpow2.f32 %v875_v12  ;;  %v916_v13 = vld [vmem:[%s2274_s10] sm:$0x1] }
 0x462   : > { %v1629_v14 = vpop.f32.mrf.mxu1 }
 0x46e   : > { %v1750_v15 = vpop.eup %1749 }
 0x46f   : > { %v1551_v16 = vadd.f32 -1.0, %v1750_v15 }
 0x471   : > { %v881_v17 = vsel %vm873_vm8, %v871_v9, %v1551_v16 }
 0x472   : > { %885 = vrot.lane.b32.xlu0 %v881_v17, %s2279_s28 }
 0x476   : > { %899 = vrot.lane.b32.xlu0 %v2006_v4, %s2279_s28 }
 0x4ad   : > { %v865_v18 = vpop.f32.mrf.mxu0 }
 0x4ae   : > { %v872_v19 = vadd.f32 %v1544_v6, %v865_v18 }
 0x4af   : > { %v1634_v20 = vpop.f32.mrf.mxu0 }
 0x4b0   : > { %v877_v21 = vmul.f32 1.442695, %v872_v19  ;;  %vm874_vm9 = vcmp.gt.f32.partialorder %v872_v19, 0.0 }
 0x4b1   : > { %v868_v22 = vpop.f32.mrf.mxu0 }
 0x4b2   : > { %1751 = vpow2.f32 %v877_v21 }
 0x4b3   : > { %v1635_v23 = vpop.f32.mrf.mxu0  ;;  %1753 = vpow2.f32 %v610_v35 }
 0x4b4   : > { %1755 = vpow2.f32 %v612_v36 }
 0x4bf   : > { %v1752_v24 = vpop.eup %1751 }
 0x4c0   : > { %v1552_v25 = vadd.f32 -1.0, %v1752_v24  ;;  %v1754_v37 = vpop.eup %1753 }
 0x4c1   : > { %v1756_v38 = vpop.eup %1755  ;;  %v614_v39 = vadd.f32 1.0, %v1754_v37 }
 0x4c2   : > { %v882_v27 = vsel %vm874_vm9, %v872_v19, %v1552_v25  ;;  %v615_v40 = vadd.f32 1.0, %v1756_v38 }
 0x4c3   : > { %887 = vrot.lane.b32.xlu1 %v882_v27, %s2279_s28  ;;  %1757 = vrcp.f32 %v614_v39 }
 0x4c4   : > { %1759 = vrcp.f32 %v615_v40 }
 0x4c7   : > { %897 = vrot.lane.b32.xlu1 %v2004_v3, %s2279_s28 }
 0x4d0   : > { %v1758_v43 = vpop.eup %1757 }
 0x4d1   : > { %v1760_v44 = vpop.eup %1759  ;;  %v893_v10 = vsub.f32 1.0, %v1758_v43 }
 0x4d2   : > { %v894_v8 = vsub.f32 1.0, %v1760_v44 }
 0x4e4   : > { %v886_v42 = vpop.permute.xlu0 %885 }
 0x4e5   : > { %v891_v50 = vmul.f32 %v1758_v43, %v886_v42 }
 0x4e8   : > { %v900_v47 = vpop.permute.xlu0 %899 }
 0x4e9   : > { %v904_v51 = vmul.f32 %v900_v47, %v894_v8 }
 0x535   : > { %v888_v46 = vpop.permute.xlu1 %887 }
 0x536   : > { %v892_v48 = vmul.f32 %v1760_v44, %v888_v46 }
 0x538   : > { %v2101_v53 = vadd.f32 %v904_v51, %v892_v48 }
 0x539   : > { %v898_v49 = vpop.permute.xlu1 %897 }
 0x53a   : > { %v903_v52 = vmul.f32 %v898_v49, %v893_v10 }
 0x53c   : > { %v2103_v54 = vadd.f32 %v903_v52, %v891_v50 }
 0x53e   : > { %v917_v55 = vpack.c.bf16 %v2101_v53, %v2103_v54 }
 0x540   : > { %919 = vrot.lane.b32.xlu1 %v917_v55, %s2282_s18 }
 0x5b2   : > { %v920_v56 = vpop.permute.xlu1 %919 }
 0x5b3   : > { %1641 = vmatmul.mubr.msk.bf16.vlgmr.msra.gmra.mxu1 %vm555_vm1, %v920_v56 }
 0x5b4   : > { %1654 = vmatprep.mubr.msk.bf16.mxu1 %vm1852_vm0, %v1851_v1 }
 0x673   : > { %v2119_v59 = vpop.f32.mrf.mxu1 }
 0x674   : > { %1761 = vtanh.f32 %v2119_v59 }
 0x675   : > { %v1642_v60 = vpop.f32.mrf.mxu1 }
 0x677   : > { %v2122_v62 = vpop.f32.mrf.mxu1 }
 0x678   : > { %1763 = vtanh.f32 %v2122_v62  ;;  %v1097_v5 = vpack.c.bf16 %v2122_v62, %v2119_v59 }
 0x679   : > { %v1643_v63 = vpop.f32.mrf.mxu1 }
 0x67a   : > { %v1128_v9 = vsel %vm752_vm2, %v1097_v5, 0  ;;  %v1197_v12 = vrot.slane %v1097_v5, 4 }
 0x67c   : > { %v1202_v14 = vsel %vm752_vm2, %v1197_v12, 0  ;;  %v983_v12 = vadd.f32 %v1556_v58, %v2119_v59 }
 0x681   : > { %v1762_v0 = vpop.eup %1761 }
 0x685   : > { %v1764_v6 = vpop.eup %1763 }
 0x686   : > { %v997_v7 = vpack.c.bf16 %v1764_v6, %v1762_v0 }
 0x688   : > { %1649 = vmatmul.mubr.msk.bf16.vlgmr.msra.gmra.mxu0 %vm555_vm1, %v997_v7  ;;  %v1011_v11 = vsel %vm555_vm1, %v997_v7, 0 }
 0x689   : > { %1659 = vmatpush3.bf16.msra.mxu0 %v1128_v9  ;;  %1653 = vmatpush3.bf16.xpose.msra.mxu1 %v1011_v11 }
 0x68a   : > { %1664 = vmatprep.subr.bf16.mxu1 %v1851_v1  ;;  %1660 = vmatprep.mubr.msk.bf16.mxu0 %vm1852_vm0, %v1851_v1 }
 0x68b   : > { %1670 = vmatprep.subr.bf16.mxu0 %v1851_v1 }
 0x690   : > { %1655 = vmatmul.mubr.msk.bf16.vlgmr.msra.gmra.mxu1 %vm555_vm1, %v916_v13  ;;  %v985_v13 = vsub.f32 0.0, %v983_v12 }
 0x691   : > { %1665 = vmatpush3.bf16.msra.mxu1 %v1202_v14  ;;  %1666 = vmatprep.mubr.msk.bf16.mxu1 %vm1852_vm0, %v1851_v1 }
 0x692   : > { %v987_v14 = vmul.f32 1.442695, %v985_v13 }
 0x748   : > { %v1047_v15 = vpop.f32.mrf.mxu0 }
 0x749   : > { %1100 = vperm.xlu1 %1726, %v1047_v15  }
 0x74a   : > { %v1650_v16 = vpop.f32.mrf.mxu0 }
 0x74c   : > { %v1050_v17 = vpop.f32.mrf.mxu0 }
 0x74d   : > { %1172 = vperm.xlu0 %1725, %v1050_v17  }
 0x74e   : > { %v1651_v18 = vpop.f32.mrf.mxu0 }
 0x750   : > { %v1091_v19 = vpop.f32.mrf.mxu1 }
 0x751   : > { %v1106_v23 = vrot.slane %v1091_v19, %v728_v32 }
 0x752   : > { %v1656_v20 = vpop.f32.mrf.mxu1 }
 0x754   : > { %v1094_v21 = vpop.f32.mrf.mxu1 }
 0x756   : > { %v1657_v22 = vpop.f32.mrf.mxu1 }
 0x7c4   : > { %v1101_v24 = vpop.permute.xlu1 %1100 }
 0x7c5   : > { %v1107_v25 = vadd.f32 %v1106_v23, %v1101_v24 }
 0x7c7   : > { %v1109_v26 = vmul.f32 0.2, %v1107_v25  ;;  %vm1108_vm10 = vcmp.ge.f32.partialorder %v1107_v25, 0.0 }
 0x7c8   : > { %v1173_v27 = vpop.permute.xlu0 %1172 }
 0x7c9   : > { %v1175_v28 = vadd.f32 %v1173_v27, %v1106_v23  ;;  %v1110_v29 = vsel %vm1108_vm10, %v1107_v25, %v1109_v26  ;;  %v1735_v23 = vld [vmem:[%s2275_s11 + $0x8] sm:$0xff]  }
 0x7ca   : > { %v1111_v30 = vsel %vm734_vm5, -999.0, %v1110_v29 }
 0x7cb   : > { %v1177_v33 = vmul.f32 0.2, %v1175_v28  ;;  %v1112_v34 = vsel %vm736_vm6, %v1111_v30, -inf  ;;  %vm1176_vm11 = vcmp.ge.f32.partialorder %v1175_v28, 0.0 }
 0x7cc   : > { %1113 = vmax.xlane.f32.xlu1 %v1112_v34  ;;  %v984_v34 = vadd.f32 %v1556_v58, %v2122_v62 }
 0x7cd   : > { %v1178_v35 = vsel %vm1176_vm11, %v1175_v28, %v1177_v33 }
 0x7ce   : > { %1180 = vrot.lane.b32.xlu0 %v1178_v35, %s1854_s27  ;;  %s2281_s27 = sand.u32 1, %s1841_s30   ;;  %v986_v35 = vsub.f32 0.0, %v984_v34 }
 0x7cf   : > { %s1532_s25 = sshll.u32 %s2281_s27, 4  ;;  %s1574_s27 = sshll.u32 %s1956_s17, 8 }
 0x7d0   : > { %s2159_s26 = scalar_lea.vmem [#allocation2], %s1532_s25  ;;  %s2300_s25 = smov 32  }
 0x7d1   : > { %s2202_s21 = scalar_lea.hbm %s2278_s14, %s1574_s27  ;;  %s1857_s17 = smov [#allocation2]  }
 0x840   : > { %v1181_v31 = vpop.permute.xlu0 %1180 }
 0x841   : > { %v1183_v32 = vsel %vm805_vm7, -999.0, %v1181_v31  ;;  %v989_v31 = vmul.f32 1.442695, %v986_v35 }
 0x842   : > { %v1184_v36 = vsel %vm736_vm6, %v1183_v32, -inf }
 0x843   : > { %1185 = vmax.xlane.f32.xlu0 %v1184_v36  ;;  %v1736_v36 = vld [vmem:[%s2275_s11] sm:$0xff]  }
 0x855   : > { %v1114_v37 = vpop.xlane.xlu1 %1113 }
 0x856   : > { %v1115_v38 = vsub.f32 %v1111_v30, %v1114_v37 }
 0x858   : > { %v1116_v41 = vmul.f32 1.442695, %v1115_v38 }
 0x85a   : > { %1765 = vpow2.f32 %v1116_v41 }
 0x867   : > { %v1766_v39 = vpop.eup %1765 }
 0x868   : > { %v1118_v40 = vsel %vm736_vm6, %v1766_v39, 0.0 }
 0x869   : > { %1119 = vadd.xlane.f32.xlu0 %v1118_v40 }
 0x8cc   : > { %v1186_v42 = vpop.xlane.xlu0 %1185 }
 0x8cd   : > { %v1187_v43 = vsub.f32 %v1183_v32, %v1186_v42 }
 0x8cf   : > { %v1188_v44 = vmul.f32 1.442695, %v1187_v43 }
 0x8d1   : > { %1767 = vpow2.f32 %v1188_v44 }
 0x8de   : > { %v1768_v46 = vpop.eup %1767 }
 0x8df   : > { %v1190_v45 = vsel %vm736_vm6, %v1768_v46, 0.0 }
 0x8e0   : > { %1191 = vadd.xlane.f32.xlu1 %v1190_v45 }
 0x8f2   : > { %v1120_v47 = vpop.xlane.xlu0 %1119 }
 0x8f3   : > { %1769 = vrcp.f32 %v1120_v47 }
 0x900   : > { %v1770_v8 = vpop.eup %1769 }
 0x901   : > { %v1122_v48 = vmul.f32 %v1770_v8, %v1766_v39 }
 0x903   : > { %v1123_v10 = vpack.c.bf16 %v1122_v48, %v1122_v48  ;;  %v1388_v49 = vmul.f32 %v1122_v48, %v2068_v61 }
 0x905   : > { %1661 = vmatmul.mubr.msk.bf16.vlgmr.msra.gmra.mxu0 %vm736_vm6, %v1123_v10  ;;  %v1390_v50 = vsub.f32 0.0, %v1388_v49 }
 0x906   : > { %1674 = vmatprep.mubr.msk.bf16.mxu0 %vm1852_vm0, %v1851_v1  ;;  %1671 = vmatpush3.bf16.msra.mxu0 %v1735_v23 }
 0x907   : > { %1392 = vst.msk [vmem:[%s2159_s26] sm:$0xff] %vm736_vm6, %v1390_v50  ;;  %1672 = vmatprep.subr.bf16.mxu0 %v1851_v1 }
 0x90a   : > { %1673 = vmatpush3.bf16.msra.mxu0 %v1736_v36 }
 0x969   : > { %v1192_v51 = vpop.xlane.xlu1 %1191 }
 0x96a   : > { %1771 = vrcp.f32 %v1192_v51 }
 0x977   : > { %v1772_v52 = vpop.eup %1771 }
 0x978   : > { %v1194_v55 = vmul.f32 %v1772_v52, %v1768_v46 }
 0x97a   : > { %v1195_v56 = vpack.c.bf16 %v1194_v55, %v1194_v55  ;;  %v1389_v57 = vmul.f32 %v1194_v55, %v2075_v2 }
 0x97c   : > { %1667 = vmatmul.mubr.msk.bf16.vlgmr.msra.gmra.mxu1 %vm736_vm6, %v1195_v56  ;;  %v1391_v61 = vsub.f32 0.0, %v1389_v57 }
 0x97e   : > { %1393 = vst.msk [vmem:[%s2159_s26 + $0x8] sm:$0xff] %vm736_vm6, %v1391_v61 }
 0x9c5   : > { %v1164_v60 = vpop.f32.mrf.mxu0 }
 0x9c6   : > { %v1244_v63 = vadd.f32 %v1556_v58, %v1164_v60 }
 0x9c7   : > { %v1662_v0 = vpop.f32.mrf.mxu0 }
 0x9c8   : > { %v1248_v5 = vmul.f32 1.442695, %v1244_v63  ;;  %vm1246_vm12 = vcmp.gt.f32.partialorder %v1244_v63, 0.0 }
 0x9c9   : > { %v1167_v6 = vpop.f32.mrf.mxu0 }
 0x9ca   : > { %1773 = vpow2.f32 %v1248_v5 }
 0x9cb   : > { %v1663_v7 = vpop.f32.mrf.mxu0  ;;  %1775 = vpow2.f32 %v987_v14 }
 0x9d7   : > { %v1774_v9 = vpop.eup %1773 }
 0x9d8   : > { %v1563_v11 = vadd.f32 -1.0, %v1774_v9  ;;  %v1776_v15 = vpop.eup %1775 }
 0x9d9   : > { %v991_v16 = vadd.f32 1.0, %v1776_v15 }
 0x9da   : > { %v1254_v2 = vsel %vm1246_vm12, %v1244_v63, %v1563_v11 }
 0x9db   : > { %1258 = vrot.lane.b32.xlu0 %v1254_v2, %s2300_s25  ;;  %1777 = vrcp.f32 %v991_v16 }
 0x9e8   : > { %v1778_v24 = vpop.eup %1777 }
 0x9e9   : > { %v1266_v26 = vsub.f32 1.0, %v1778_v24 }
 0x9eb   : > { %v1268_v30 = vmul.f32 %v1266_v26, %v2103_v54 }
 0xa3c   : > { %v1238_v17 = vpop.f32.mrf.mxu1 }
 0xa3d   : > { %v1245_v18 = vadd.f32 %v1556_v58, %v1238_v17 }
 0xa3e   : > { %v1668_v19 = vpop.f32.mrf.mxu1 }
 0xa3f   : > { %v1250_v20 = vmul.f32 1.442695, %v1245_v18  ;;  %vm1247_vm13 = vcmp.gt.f32.partialorder %v1245_v18, 0.0 }
 0xa40   : > { %v1241_v21 = vpop.f32.mrf.mxu1 }
 0xa41   : > { %1779 = vpow2.f32 %v1250_v20 }
 0xa42   : > { %v1669_v22 = vpop.f32.mrf.mxu1  ;;  %1781 = vpow2.f32 %v989_v31 }
 0xa4d   : > { %v1259_v59 = vpop.permute.xlu0 %1258 }
 0xa4e   : > { %v1780_v25 = vpop.eup %1779  ;;  %v1264_v28 = vmul.f32 %v1778_v24, %v1259_v59 }
 0xa4f   : > { %v1564_v27 = vadd.f32 -1.0, %v1780_v25  ;;  %v1782_v1 = vpop.eup %1781 }
 0xa50   : > { %v1270_v33 = vadd.f32 %v1268_v30, %v1264_v28  ;;  %v992_v32 = vadd.f32 1.0, %v1782_v1 }
 0xa51   : > { %v1255_v29 = vsel %vm1247_vm13, %v1245_v18, %v1564_v27 }
 0xa52   : > { %1260 = vrot.lane.b32.xlu1 %v1255_v29, %s2300_s25  ;;  %1783 = vrcp.f32 %v992_v32 }
 0xa56   : > { %1274 = vrot.lane.b32.xlu1 %v1270_v33, %s2282_s18 }
 0xa5f   : > { %v1784_v37 = vpop.eup %1783 }
 0xa60   : > { %v1267_v54 = vsub.f32 1.0, %v1784_v37 }
 0xa62   : > { %v1269_v41 = vmul.f32 %v1267_v54, %v2101_v53  ;;  %v1565_v53 = vld [vmem:[%s2276_s12] ss:$0 sm:$0xff] }
 0xac4   : > { %v1261_v38 = vpop.permute.xlu1 %1260 }
 0xac5   : > { %v1265_v39 = vmul.f32 %v1784_v37, %v1261_v38 }
 0xac7   : > { %v1271_v40 = vadd.f32 %v1269_v41, %v1265_v39 }
 0xac8   : > { %v2185_v62 = vpop.permute.xlu1 %1274 }
 0xac9   : > { %1276 = vrot.lane.b32.xlu0 %v1271_v40, %s2282_s18  ;;  %v1280_v43 = vadd.f32 %v2185_v62, %v2004_v3  ;;  %s1417_s18 = sshll.u32 %s2159_s26, 4  ;;  %s1793_s26 = sshll.u32 %s1857_s17, 4  ;;  %s2205_s18 = int_to_ptr.vmem [resolvable:$true] %s1417_s18  ;;  %s1794_s26 = int_to_ptr.vmem [resolvable:$false] %s1793_s26 }
 0xaca   : > { %s1789_s5 = scalar_lea.vmem %s2205_s18, 256  ;;  %s1795_s0 = scalar_lea.vmem %s1794_s26, 512 }
 0xacb   : > { %p1790_p11 = scmp.ne.s32.totalorder %s2205_s18, %s1789_s5  ;;  %p1796_p0 = scmp.lt.s32.totalorder %s2205_s18, %s1794_s26 }
 0xacc   : > { %p1797_p1 = scmp.lt.s32.totalorder %s1795_s0, %s1789_s5 }
 0xacd   : > { %p1791_p12 = pnand %p1790_p11, %p1973_p5 }
 0xace   : > { %p1798_p2 = por %p1797_p1, %p1796_p0 }
 0xacf   : > { %p1792_p13 = pneg %p1791_p12 }
 0xad1   : > { %p1799_p3 = pnand %p1798_p2, %p1792_p13 }
 0xb3b   : > { %v2187_v42 = vpop.permute.xlu0 %1276 }
 0xb3c   : > { %v1281_v44 = vadd.f32 %v2187_v42, %v2006_v4 }
 0xb3e   : > { %v1282_v46 = vpack.c.bf16 %v1281_v44, %v1280_v43 }
 0xb40   : > { %1675 = vmatmul.mubr.msk.bf16.vlgmr.msra.gmra.mxu0 %vm555_vm1, %v1282_v46 }
 0xc00   : > { %v1343_v45 = vpop.f32.mrf.mxu0 }
 0xc01   : > { %v1344_v47 = vadd.f32 %v1565_v53, %v1343_v45 }
 0xc02   : > { %v1676_v8 = vpop.f32.mrf.mxu0 }
 0xc03   : > { %v1350_v48 = vmul.f32 0.5, %v1344_v47 }
 0xc04   : > { %v1346_v10 = vpop.f32.mrf.mxu0 }
 0xc05   : > { %v1352_v49 = vmul.f32 1.442695, %v1350_v48  ;;  %v1347_v3 = vadd.f32 %v1565_v53, %v1346_v10 }
 0xc06   : > { %v1677_v50 = vpop.f32.mrf.mxu0 }
 0xc07   : > { %1785 = vpow2.f32 %v1352_v49  ;;  %v1351_v4 = vmul.f32 0.5, %v1347_v3 }
 0xc09   : > { %v1354_v51 = vmul.f32 1.442695, %v1351_v4 }
 0xc0b   : > { %1787 = vpow2.f32 %v1354_v51 }
 0xc14   : > { %v1786_v52 = vpop.eup %1785 }
 0xc15   : > { %1360 = vrot.lane.b32.xlu1 %v1786_v52, %s2301_s1 }
 0xc16   : > { %1802 = shalt.err (!%p1799_p3)
}
 0xc17   : > { %s1803_s3 = scalar_lea.hbm %s2202_s21, 256  ;;  %s1807_s17 = scalar_lea.hbm %s2278_s14, 512 }
 0xc18   : > { %p1804_p4 = scmp.ne.s32.totalorder %s2202_s21, %s1803_s3  ;;  %p1808_p9 = scmp.lt.s32.totalorder %s2202_s21, %s2278_s14 }
 0xc19   : > { %p1809_p10 = scmp.lt.s32.totalorder %s1807_s17, %s1803_s3 }
 0xc1a   : > { %p1805_p7 = pnand %p1804_p4, %p1973_p5 }
 0xc1b   : > { %p1810_p11 = por %p1809_p10, %p1808_p9 }
 0xc1c   : > { %p1806_p8 = pneg %p1805_p7 }
 0xc1e   : > { %p1811_p12 = pnand %p1810_p11, %p1806_p8 }
 0xc20   : > { %1814 = shalt.err (!%p1811_p12)
}
 0xc21   : > { %s1858_s5 = smov 128   ;;  %s1859_s26 = smov 8   ;;  %v1788_v55 = vpop.eup %1787  ;;  %1374 = vrot.lane.b32.xlu1 %v1344_v47, %s2300_s25  ;;  %vm1382_vm14 = vcmask 523264   ;;  %vm1385_vm15 = vcmask 785408  }
 0xc22   : > { %1678 = dma.vmem_to_hbm [thread:$0]  (%p1973_p5), %s2205_s18, 256, %s2202_s21, %s2209_s4, %s1858_s5, %s1858_s5, %s1859_s26  }
 0xc23   : > { %1362 = vrot.lane.b32.xlu0 %v1788_v55, %s2301_s1  ;;  %s518_s0 = scalar_lea.vmem %s2266_s2, %s1997_s20  ;;  %s524_s1 = scalar_lea.vmem %s2277_s13, %s1997_s20 }
 0xc24   : > { %v1356_v56 = vld [vmem:[%s518_s0] sm:$0xff]  ;;  %v1357_v58 = vld [vmem:[%s518_s0 + $0x8] sm:$0xff] }
 0xc27   : > { %1376 = vrot.lane.b32.xlu0 %v1347_v3, %s2300_s25 }
 0xc87   : > { %v1361_v57 = vpop.permute.xlu1 %1360 }
 0xc88   : > { %v1366_v61 = vmul.f32 %v1361_v57, %v1356_v56 }
 0xc8a   : > { %v1368_v60 = vadd.f32 %v1366_v61, %v1344_v47 }
 0xc8c   : > { %v1370_v0 = vsub.f32 %v1368_v60, %v2185_v62 }
 0xc93   : > { %v1375_v6 = vpop.permute.xlu1 %1374 }
 0xc94   : > { %v1380_v7 = vsel %vm555_vm1, %v1370_v0, %v1375_v6 }
 0xc95   : > { %v1363_v63 = vpop.permute.xlu0 %1362  ;;  %v1383_v11 = vsel %vm1382_vm14, %v1380_v7, %v1375_v6 }
 0xc96   : > { %v1367_v5 = vmul.f32 %v1363_v63, %v1357_v58  ;;  %1386 = vst.msk [vmem:[%s524_s1] sm:$0xff] %vm1385_vm15, %v1383_v11 }
 0xc98   : > { %v1369_v9 = vadd.f32 %v1367_v5, %v1347_v3 }
 0xc99   : > { %v1377_v12 = vpop.permute.xlu0 %1376 }
 0xc9a   : > { %v1371_v2 = vsub.f32 %v1369_v9, %v2187_v42 }
 0xc9c   : > { %v1381_v13 = vsel %vm555_vm1, %v1371_v2, %v1377_v12 }
 0xc9d   : > { %v1384_v14 = vsel %vm1382_vm14, %v1381_v13, %v1377_v12 }
 0xc9e   : > { %1387 = vst.msk [vmem:[%s524_s1 + $0x8] sm:$0xff] %vm1385_vm15, %v1384_v14 }
 0xc9f PF: > { %p1684_p5 = scmp.ge.s32.totalorder %s1849_s16, 2  ;;  %s1440_s20 = sand.u32 1, %s1837_s29  }
 0xca0   : > { %s1441_s18 = scalar_lea.sflag [#allocation3], %s1440_s20 }
 0xca1   : > { %p1681_p13 = pnand %p1684_p5, %p1977_p6 }
 0xca3   : > { %p1682_p0 = pneg %p1681_p13 }
 0xca5   : > { %1832 = dma.done.wait (%p1682_p0), %s1441_s18, 256  }
 0xca6   : > { %1834 = vsyncadd (%p1682_p0), %s1441_s18, 4294967040  ;;  %p25_p1 = scmp.ge.s32.totalorder %s1960_s19, 4   ;;  %s2303_s29 = smov %s1841_s30 }
 0xca7   : > { %s2304_s30 = smov %s1845_s15  ;;  %s2305_s15 = smov %s1971_s22 }
 0xca8   : > { %s2306_s16 = smov %s1960_s19  ;;  %27 = sbr.rel (!%p25_p1) target bundleno = 11 (0xb), region = 125 }
 0xcad   :  { %1446 = vsyncpa [#allocation3], 1 }
 0xcae   :  { %1448 = vsyncpa [#allocation3 + $0x1], 1 }

</bundles_post_ra>
